<compile_context>
chip_gen: v5e
topology: v5e:2x2
jax: 0.10.0
libtpu: 0.0.40
codegen_flags: <defaults>
</compile_context>

<pallas_src>
import jax
import jax.numpy as jnp
from jax import lax
from jax.experimental import pallas as pl
from jax.experimental.pallas import tpu as pltpu


# ----------------------------------------------------------------------------
# Separable bicubic interpolation matrix (PyTorch-compatible, a=-0.75,
# align_corners=False, edge-clamped). Built at trace time, outside the kernel.
# ----------------------------------------------------------------------------
def _cubic_weight(x, a=-0.75):
    x = jnp.abs(x)
    w1 = (a + 2.0) * x ** 3 - (a + 3.0) * x ** 2 + 1.0          # |x| <= 1
    w2 = a * x ** 3 - 5.0 * a * x ** 2 + 8.0 * a * x - 4.0 * a  # 1 < |x| < 2
    return jnp.where(x <= 1.0, w1, jnp.where(x < 2.0, w2, 0.0))


def build_bicubic_matrix(in_size: int, scale: int = 4) -> jnp.ndarray:
    """A of shape (in_size*scale, in_size) such that up = A @ x (1-D bicubic)."""
    out_size = in_size * scale
    o = jnp.arange(out_size, dtype=jnp.float32)
    src = (o + 0.5) / scale - 0.5
    i0 = jnp.floor(src).astype(jnp.int32)
    frac = src - i0.astype(jnp.float32)
    A = jnp.zeros((out_size, in_size), dtype=jnp.float32)
    rows = jnp.arange(out_size)
    for t in (-1, 0, 1, 2):
        idx = jnp.clip(i0 + t, 0, in_size - 1)
        w = _cubic_weight(frac - t)
        A = A.at[rows, idx].add(w)
    return A


# ----------------------------------------------------------------------------
# Per-generation VMEM sizing (v5e/v6e: 128 MiB physical, v7x: 64 MiB per core).
# ----------------------------------------------------------------------------
def _vmem_limits():
    try:
        cap = int(pltpu.get_tpu_info().vmem_capacity_bytes)
    except Exception:
        cap = None
    if not cap or cap <= 0:
        cap = 64 * 1024 * 1024                       # conservative (v7x-sized) fallback
    limit = min(int(cap * 0.85), cap - (8 << 20))    # never request all of physical VMEM
    limit = max(limit, 16 << 20)
    budget = int(limit * 0.80)                       # what the B-chooser may spend on blocks
    return limit, budget


# ----------------------------------------------------------------------------
# Slabs-per-grid-step selection. Only counts quantities that scale with B.
# ----------------------------------------------------------------------------
def _choose_block_slabs(nc, h, w, out_isz, in_isz, cdt_isz, budget):
    ho, wo = 4 * h, 4 * w
    per_slab = (
        2 * ho * wo * out_isz        # output block, double-buffered
        + 2 * 2 * h * w * in_isz     # input1 + input2 blocks, double-buffered
        + 2 * ho * w * cdt_isz       # t1 + t2 scratch rows (single copy)
        + 3 * ho * wo * 4            # f32 `o` + one live upsample + elementwise temps
    )
    fixed = 2 * (ho * h + w * wo) * cdt_isz + 2 * 8 * 128 * 4   # Ah/Awt + partial block
    b = max(1, (budget - fixed) // per_slab)
    b = int(min(b, nc))
    if nc >= 2:
        b = min(b, -(-nc // 2))      # keep >= 2 grid steps so both v7x cores get work
    # Prefer the largest divisor of nc at/below b: removes the ragged-chunk mask.
    div = 1
    for d in range(b, 0, -1):
        if nc % d == 0:
            div = d
            break
    if 3 * div >= 2 * b:             # divisor is close enough to the budget-derived B
        return div, False
    return b, True                   # keep the bigger B, mask the ragged last chunk


# ----------------------------------------------------------------------------
# Pallas kernel wrapper.
# ----------------------------------------------------------------------------
def dual_input_consistency_loss(output, input1, input2, block_slabs=None):
    """output: (N, C, 4H, 4W); input1/input2: (N, C, H, W). Returns scalar f32."""
    N, C, Ho, Wo = output.shape
    _, _, H, W = input1.shape
    assert Ho == 4 * H and Wo == 4 * W, "output must be 4x the input spatial size"
    assert input2.shape == input1.shape
    NC = N * C

    # Free reshapes only -- no extra HBM pass over the big `output`.
    y3d = output.reshape(NC, Ho, Wo)
    x1_3d = input1.reshape(NC, H, W)
    x2_3d = input2.reshape(NC, H, W)

    # MXU operand dtype: keep bf16 if the inputs are bf16, f32 otherwise.
    cdt = (jnp.bfloat16
           if (input1.dtype == jnp.bfloat16 and input2.dtype == jnp.bfloat16)
           else jnp.float32)
    cdt_isz = jnp.dtype(cdt).itemsize

    Ah = build_bicubic_matrix(H, 4).astype(cdt)        # (Ho, H)
    Awt = build_bicubic_matrix(W, 4).T.astype(cdt)     # (W, Wo)  (pre-transposed)

    vmem_limit, vmem_budget = _vmem_limits()
    if block_slabs is None:
        B, need_mask = _choose_block_slabs(
            NC, H, W, output.dtype.itemsize, input1.dtype.itemsize, cdt_isz,
            vmem_budget)
    else:
        B = max(1, min(int(block_slabs), NC))
        need_mask = (NC % B) != 0
    n_chunks = -(-NC // B)
    ho_aligned = (Ho % 8 == 0)       # true for any H >= 2 that is even; hint only

    def kernel(y_ref, x1_ref, x2_ref, ah_ref, awt_ref, part_ref, t1_ref, t2_ref):
        ah = ah_ref[...]             # (Ho, H)
        awt = awt_ref[...]           # (W, Wo)

        # ---- H-direction: small per-slab matmuls into VMEM scratch --------
        def slab_body(b, carry):
            off = b * Ho
            if ho_aligned:
                off = pl.multiple_of(off, 8)
            t1_ref[pl.ds(off, Ho), :] = jnp.dot(
                ah, x1_ref[b].astype(cdt),
                preferred_element_type=jnp.float32).astype(cdt)
            t2_ref[pl.ds(off, Ho), :] = jnp.dot(
                ah, x2_ref[b].astype(cdt),
                preferred_element_type=jnp.float32).astype(cdt)
            return carry

        lax.fori_loop(0, B, slab_body, 0, unroll=min(4, B))

        # ---- W-direction: one wide matmul per input + streamed epilogue ---
        o = y_ref[...].reshape(B * Ho, Wo).astype(jnp.float32)

        if need_mask:
            rows = lax.broadcasted_iota(jnp.int32, (B * Ho, 1), 0)
            # valid slabs occupy the first (NC - i*B)*Ho rows of the block
            valid = rows < (NC - pl.program_id(0) * B) * Ho

        d1 = o - jnp.dot(t1_ref[...], awt, preferred_element_type=jnp.float32)
        e1 = d1 * d1
        if need_mask:
            e1 = jnp.where(valid, e1, 0.0)       # where: NaN/Inf-safe masking
        sse = jnp.sum(e1)

        d2 = o - jnp.dot(t2_ref[...], awt, preferred_element_type=jnp.float32)
        e2 = d2 * d2
        if need_mask:
            e2 = jnp.where(valid, e2, 0.0)
        sse = sse + jnp.sum(e2)

        # Lane-dense unmasked store of this chunk's partial sum.
        part_ref[...] = jnp.full((1, 8, 128), sse, dtype=jnp.float32)

    partials = pl.pallas_call(
        kernel,
        out_shape=jax.ShapeDtypeStruct((n_chunks, 8, 128), jnp.float32),
        grid_spec=pltpu.PrefetchScalarGridSpec(
            num_scalar_prefetch=0,
            grid=(n_chunks,),
            in_specs=[
                pl.BlockSpec((B, Ho, Wo), lambda i: (i, 0, 0)),   # output slabs
                pl.BlockSpec((B, H, W), lambda i: (i, 0, 0)),     # input1 slabs
                pl.BlockSpec((B, H, W), lambda i: (i, 0, 0)),     # input2 slabs
                pl.BlockSpec((Ho, H), lambda i: (0, 0)),          # Ah (constant)
                pl.BlockSpec((W, Wo), lambda i: (0, 0)),          # Aw^T (constant)
            ],
            out_specs=pl.BlockSpec((1, 8, 128), lambda i: (i, 0, 0)),
            scratch_shapes=[
                pltpu.VMEM((B * Ho, W), cdt),    # t1: H-pass result, input1
                pltpu.VMEM((B * Ho, W), cdt),    # t2: H-pass result, input2
            ],
        ),
        compiler_params=pltpu.CompilerParams(
            dimension_semantics=("parallel",),   # independent per-chunk partials
            vmem_limit_bytes=int(vmem_limit),
        ),
    )(y3d, x1_3d, x2_3d, Ah, Awt)

    sse = jnp.sum(partials[:, 0, 0])
    numel = NC * Ho * Wo
    # (loss1 + loss2) / 2 = (sse1 + sse2) / (2 * numel)
    return sse / (2.0 * numel)


# ----------------------------------------------------------------------------
# Plain-JAX reference (same interpolation matrices) for a sanity check.
# ----------------------------------------------------------------------------
def _reference_loss(output, input1, input2):
    N, C, Ho, Wo = output.shape
    _, _, H, W = input1.shape
    Ah = build_bicubic_matrix(H, 4)
    Aw = build_bicubic_matrix(W, 4)

    def up(x):
        return jnp.einsum("oh,nchw,pw->ncop", Ah, x.astype(jnp.float32), Aw)

    o = output.astype(jnp.float32)
    l1 = jnp.mean((o - up(input1)) ** 2)
    l2 = jnp.mean((o - up(input2)) ** 2)
    return (l1 + l2) / 2.0


if __name__ == "__main__":
    key = jax.random.PRNGKey(0)
    k1, k2, k3 = jax.random.split(key, 3)

    # Main check: even NC, divisor B (unmasked fast path), 2 parallel chunks.
    N, C, H, W = 2, 4, 8, 8            # output is 4x upscaled spatially
    output = jax.random.normal(k1, (N, C, 4 * H, 4 * W), dtype=jnp.float32)
    input1 = jax.random.normal(k2, (N, C, H, W), dtype=jnp.float32)
    input2 = jax.random.normal(k3, (N, C, H, W), dtype=jnp.float32)

    loss = jax.block_until_ready(dual_input_consistency_loss(output, input1, input2))
    ref = jax.block_until_ready(_reference_loss(output, input1, input2))
    assert jnp.isfinite(loss), "non-finite loss"
    assert jnp.allclose(loss, ref, rtol=1e-4, atol=1e-6), (loss, ref)

    # Secondary check: ragged last chunk (NC=3, B=2) exercises the masked path.
    k4, k5, k6 = jax.random.split(k3, 3)
    out_b = jax.random.normal(k4, (1, 3, 4 * H, 4 * W), dtype=jnp.float32)
    in1_b = jax.random.normal(k5, (1, 3, H, W), dtype=jnp.float32)
    in2_b = jax.random.normal(k6, (1, 3, H, W), dtype=jnp.float32)
    loss_b = jax.block_until_ready(
        dual_input_consistency_loss(out_b, in1_b, in2_b, block_slabs=2))
    ref_b = jax.block_until_ready(_reference_loss(out_b, in1_b, in2_b))
    assert jnp.isfinite(loss_b), "non-finite masked-path loss"
    assert jnp.allclose(loss_b, ref_b, rtol=1e-4, atol=1e-6), (loss_b, ref_b)

    print("KERNEL_OK")
</pallas_src>

<mosaic_0001>
module attributes {stable_mosaic.version = 11 : i64} {
  func.func @kernel(%arg0: i32, %arg1: memref<4x32x32xf32, #tpu.memory_space<vmem>>, %arg2: memref<4x8x8xf32, #tpu.memory_space<vmem>>, %arg3: memref<4x8x8xf32, #tpu.memory_space<vmem>>, %arg4: memref<32x8xf32, #tpu.memory_space<vmem>>, %arg5: memref<8x32xf32, #tpu.memory_space<vmem>>, %arg6: memref<1x8x128xf32, #tpu.memory_space<vmem>>, %arg7: memref<128x8xf32, #tpu.memory_space<vmem>>, %arg8: memref<128x8xf32, #tpu.memory_space<vmem>>) attributes {dimension_semantics = [#tpu.dimension_semantics<parallel>], iteration_bounds = array<i64: 2>, scalar_prefetch = 0 : i64, scratch_operands = 2 : i64, tpu.core_type = #tpu.core_type<tc>, window_params = [{transform_indices = @transform_0, window_bounds = array<i64: 4, 32, 32>}, {transform_indices = @transform_1, window_bounds = array<i64: 4, 8, 8>}, {transform_indices = @transform_2, window_bounds = array<i64: 4, 8, 8>}, {pipeline_mode = #tpu.pipeline_mode<synchronous>, transform_indices = @transform_3, window_bounds = array<i64: 32, 8>}, {pipeline_mode = #tpu.pipeline_mode<synchronous>, transform_indices = @transform_4, window_bounds = array<i64: 8, 32>}, {transform_indices = @transform_5, window_bounds = array<i64: 1, 8, 128>}]} {
    %c0 = arith.constant 0 : index
    %c0_0 = arith.constant 0 : index
    %0 = vector.load %arg4[%c0, %c0_0] : memref<32x8xf32, #tpu.memory_space<vmem>>, vector<32x8xf32>
    %c0_1 = arith.constant 0 : index
    %c0_2 = arith.constant 0 : index
    %1 = vector.load %arg5[%c0_1, %c0_2] : memref<8x32xf32, #tpu.memory_space<vmem>>, vector<8x32xf32>
    %c0_i32 = arith.constant 0 : i32
    %c32_i32 = arith.constant 32 : i32
    %2 = arith.muli %c0_i32, %c32_i32 : i32
    %3 = tpu.assume_multiple %2, 8 : i32
    %4 = arith.index_cast %c0_i32 : i32 to index
    %c0_3 = arith.constant 0 : index
    %c0_4 = arith.constant 0 : index
    %5 = vector.load %arg2[%4, %c0_3, %c0_4] : memref<4x8x8xf32, #tpu.memory_space<vmem>>, vector<1x8x8xf32>
    %6 = vector.shape_cast %5 : vector<1x8x8xf32> to vector<8x8xf32>
    %cst = arith.constant dense<0.000000e+00> : vector<32x8xf32>
    %7 = tpu.matmul %0, %6, %cst {dimension_numbers = #tpu.dot_dimension_numbers<[1], [0], [0], [1], [0, 0, 1, 1], [], []>} : vector<32x8xf32>, vector<8x8xf32>, vector<32x8xf32> -> vector<32x8xf32>
    %8 = arith.index_cast %3 : i32 to index
    %c0_5 = arith.constant 0 : index
    %9 = vector.load %arg7[%8, %c0_5] : memref<128x8xf32, #tpu.memory_space<vmem>>, vector<32x8xf32>
    tpu.vector_store %arg7[%8, %c0_5], %7 {strides = array<i32>} : memref<128x8xf32, #tpu.memory_space<vmem>>, vector<32x8xf32>,
    %10 = arith.index_cast %c0_i32 : i32 to index
    %c0_6 = arith.constant 0 : index
    %c0_7 = arith.constant 0 : index
    %11 = vector.load %arg3[%10, %c0_6, %c0_7] : memref<4x8x8xf32, #tpu.memory_space<vmem>>, vector<1x8x8xf32>
    %12 = vector.shape_cast %11 : vector<1x8x8xf32> to vector<8x8xf32>
    %cst_8 = arith.constant dense<0.000000e+00> : vector<32x8xf32>
    %13 = tpu.matmul %0, %12, %cst_8 {dimension_numbers = #tpu.dot_dimension_numbers<[1], [0], [0], [1], [0, 0, 1, 1], [], []>} : vector<32x8xf32>, vector<8x8xf32>, vector<32x8xf32> -> vector<32x8xf32>
    %14 = arith.index_cast %3 : i32 to index
    %c0_9 = arith.constant 0 : index
    %15 = vector.load %arg8[%14, %c0_9] : memref<128x8xf32, #tpu.memory_space<vmem>>, vector<32x8xf32>
    tpu.vector_store %arg8[%14, %c0_9], %13 {strides = array<i32>} : memref<128x8xf32, #tpu.memory_space<vmem>>, vector<32x8xf32>,
    %c1_i32 = arith.constant 1 : i32
    %c32_i32_10 = arith.constant 32 : i32
    %16 = arith.muli %c1_i32, %c32_i32_10 : i32
    %17 = tpu.assume_multiple %16, 8 : i32
    %18 = arith.index_cast %c1_i32 : i32 to index
    %c0_11 = arith.constant 0 : index
    %c0_12 = arith.constant 0 : index
    %19 = vector.load %arg2[%18, %c0_11, %c0_12] : memref<4x8x8xf32, #tpu.memory_space<vmem>>, vector<1x8x8xf32>
    %20 = vector.shape_cast %19 : vector<1x8x8xf32> to vector<8x8xf32>
    %cst_13 = arith.constant dense<0.000000e+00> : vector<32x8xf32>
    %21 = tpu.matmul %0, %20, %cst_13 {dimension_numbers = #tpu.dot_dimension_numbers<[1], [0], [0], [1], [0, 0, 1, 1], [], []>} : vector<32x8xf32>, vector<8x8xf32>, vector<32x8xf32> -> vector<32x8xf32>
    %22 = arith.index_cast %17 : i32 to index
    %c0_14 = arith.constant 0 : index
    %23 = vector.load %arg7[%22, %c0_14] : memref<128x8xf32, #tpu.memory_space<vmem>>, vector<32x8xf32>
    tpu.vector_store %arg7[%22, %c0_14], %21 {strides = array<i32>} : memref<128x8xf32, #tpu.memory_space<vmem>>, vector<32x8xf32>,
    %24 = arith.index_cast %c1_i32 : i32 to index
    %c0_15 = arith.constant 0 : index
    %c0_16 = arith.constant 0 : index
    %25 = vector.load %arg3[%24, %c0_15, %c0_16] : memref<4x8x8xf32, #tpu.memory_space<vmem>>, vector<1x8x8xf32>
    %26 = vector.shape_cast %25 : vector<1x8x8xf32> to vector<8x8xf32>
    %cst_17 = arith.constant dense<0.000000e+00> : vector<32x8xf32>
    %27 = tpu.matmul %0, %26, %cst_17 {dimension_numbers = #tpu.dot_dimension_numbers<[1], [0], [0], [1], [0, 0, 1, 1], [], []>} : vector<32x8xf32>, vector<8x8xf32>, vector<32x8xf32> -> vector<32x8xf32>
    %28 = arith.index_cast %17 : i32 to index
    %c0_18 = arith.constant 0 : index
    %29 = vector.load %arg8[%28, %c0_18] : memref<128x8xf32, #tpu.memory_space<vmem>>, vector<32x8xf32>
    tpu.vector_store %arg8[%28, %c0_18], %27 {strides = array<i32>} : memref<128x8xf32, #tpu.memory_space<vmem>>, vector<32x8xf32>,
    %c2_i32 = arith.constant 2 : i32
    %c32_i32_19 = arith.constant 32 : i32
    %30 = arith.muli %c2_i32, %c32_i32_19 : i32
    %31 = tpu.assume_multiple %30, 8 : i32
    %32 = arith.index_cast %c2_i32 : i32 to index
    %c0_20 = arith.constant 0 : index
    %c0_21 = arith.constant 0 : index
    %33 = vector.load %arg2[%32, %c0_20, %c0_21] : memref<4x8x8xf32, #tpu.memory_space<vmem>>, vector<1x8x8xf32>
    %34 = vector.shape_cast %33 : vector<1x8x8xf32> to vector<8x8xf32>
    %cst_22 = arith.constant dense<0.000000e+00> : vector<32x8xf32>
    %35 = tpu.matmul %0, %34, %cst_22 {dimension_numbers = #tpu.dot_dimension_numbers<[1], [0], [0], [1], [0, 0, 1, 1], [], []>} : vector<32x8xf32>, vector<8x8xf32>, vector<32x8xf32> -> vector<32x8xf32>
    %36 = arith.index_cast %31 : i32 to index
    %c0_23 = arith.constant 0 : index
    %37 = vector.load %arg7[%36, %c0_23] : memref<128x8xf32, #tpu.memory_space<vmem>>, vector<32x8xf32>
    tpu.vector_store %arg7[%36, %c0_23], %35 {strides = array<i32>} : memref<128x8xf32, #tpu.memory_space<vmem>>, vector<32x8xf32>,
    %38 = arith.index_cast %c2_i32 : i32 to index
    %c0_24 = arith.constant 0 : index
    %c0_25 = arith.constant 0 : index
    %39 = vector.load %arg3[%38, %c0_24, %c0_25] : memref<4x8x8xf32, #tpu.memory_space<vmem>>, vector<1x8x8xf32>
    %40 = vector.shape_cast %39 : vector<1x8x8xf32> to vector<8x8xf32>
    %cst_26 = arith.constant dense<0.000000e+00> : vector<32x8xf32>
    %41 = tpu.matmul %0, %40, %cst_26 {dimension_numbers = #tpu.dot_dimension_numbers<[1], [0], [0], [1], [0, 0, 1, 1], [], []>} : vector<32x8xf32>, vector<8x8xf32>, vector<32x8xf32> -> vector<32x8xf32>
    %42 = arith.index_cast %31 : i32 to index
    %c0_27 = arith.constant 0 : index
    %43 = vector.load %arg8[%42, %c0_27] : memref<128x8xf32, #tpu.memory_space<vmem>>, vector<32x8xf32>
    tpu.vector_store %arg8[%42, %c0_27], %41 {strides = array<i32>} : memref<128x8xf32, #tpu.memory_space<vmem>>, vector<32x8xf32>,
    %c3_i32 = arith.constant 3 : i32
    %c32_i32_28 = arith.constant 32 : i32
    %44 = arith.muli %c3_i32, %c32_i32_28 : i32
    %45 = tpu.assume_multiple %44, 8 : i32
    %46 = arith.index_cast %c3_i32 : i32 to index
    %c0_29 = arith.constant 0 : index
    %c0_30 = arith.constant 0 : index
    %47 = vector.load %arg2[%46, %c0_29, %c0_30] : memref<4x8x8xf32, #tpu.memory_space<vmem>>, vector<1x8x8xf32>
    %48 = vector.shape_cast %47 : vector<1x8x8xf32> to vector<8x8xf32>
    %cst_31 = arith.constant dense<0.000000e+00> : vector<32x8xf32>
    %49 = tpu.matmul %0, %48, %cst_31 {dimension_numbers = #tpu.dot_dimension_numbers<[1], [0], [0], [1], [0, 0, 1, 1], [], []>} : vector<32x8xf32>, vector<8x8xf32>, vector<32x8xf32> -> vector<32x8xf32>
    %50 = arith.index_cast %45 : i32 to index
    %c0_32 = arith.constant 0 : index
    %51 = vector.load %arg7[%50, %c0_32] : memref<128x8xf32, #tpu.memory_space<vmem>>, vector<32x8xf32>
    tpu.vector_store %arg7[%50, %c0_32], %49 {strides = array<i32>} : memref<128x8xf32, #tpu.memory_space<vmem>>, vector<32x8xf32>,
    %52 = arith.index_cast %c3_i32 : i32 to index
    %c0_33 = arith.constant 0 : index
    %c0_34 = arith.constant 0 : index
    %53 = vector.load %arg3[%52, %c0_33, %c0_34] : memref<4x8x8xf32, #tpu.memory_space<vmem>>, vector<1x8x8xf32>
    %54 = vector.shape_cast %53 : vector<1x8x8xf32> to vector<8x8xf32>
    %cst_35 = arith.constant dense<0.000000e+00> : vector<32x8xf32>
    %55 = tpu.matmul %0, %54, %cst_35 {dimension_numbers = #tpu.dot_dimension_numbers<[1], [0], [0], [1], [0, 0, 1, 1], [], []>} : vector<32x8xf32>, vector<8x8xf32>, vector<32x8xf32> -> vector<32x8xf32>
    %56 = arith.index_cast %45 : i32 to index
    %c0_36 = arith.constant 0 : index
    %57 = vector.load %arg8[%56, %c0_36] : memref<128x8xf32, #tpu.memory_space<vmem>>, vector<32x8xf32>
    tpu.vector_store %arg8[%56, %c0_36], %55 {strides = array<i32>} : memref<128x8xf32, #tpu.memory_space<vmem>>, vector<32x8xf32>,
    %c4_i32 = arith.constant 4 : i32
    %c0_37 = arith.constant 0 : index
    %c0_38 = arith.constant 0 : index
    %c0_39 = arith.constant 0 : index
    %58 = vector.load %arg1[%c0_37, %c0_38, %c0_39] : memref<4x32x32xf32, #tpu.memory_space<vmem>>, vector<4x32x32xf32>
    %59 = vector.shape_cast %58 : vector<4x32x32xf32> to vector<128x32xf32>
    %c0_40 = arith.constant 0 : index
    %c0_41 = arith.constant 0 : index
    %60 = vector.load %arg7[%c0_40, %c0_41] : memref<128x8xf32, #tpu.memory_space<vmem>>, vector<128x8xf32>
    %cst_42 = arith.constant dense<0.000000e+00> : vector<128x32xf32>
    %61 = tpu.matmul %60, %1, %cst_42 {dimension_numbers = #tpu.dot_dimension_numbers<[1], [0], [0], [1], [0, 0, 1, 1], [], []>} : vector<128x8xf32>, vector<8x32xf32>, vector<128x32xf32> -> vector<128x32xf32>
    %62 = arith.subf %59, %61 : vector<128x32xf32>
    %63 = arith.mulf %62, %62 : vector<128x32xf32>
    %64 = vector.shape_cast %63 : vector<128x32xf32> to vector<1x128x32xf32>
    %cst_43 = arith.constant dense<0.000000e+00> : vector<1xf32>
    %65 = vector.multi_reduction <add>, %64, %cst_43 [1, 2] : vector<1x128x32xf32> to vector<1xf32>
    %66 = vector.shape_cast %65 : vector<1xf32> to vector<1x1x1xf32>
    %67 = vector.extract %66[0, 0, 0] : f32 from vector<1x1x1xf32>
    %c0_44 = arith.constant 0 : index
    %c0_45 = arith.constant 0 : index
    %68 = vector.load %arg8[%c0_44, %c0_45] : memref<128x8xf32, #tpu.memory_space<vmem>>, vector<128x8xf32>
    %cst_46 = arith.constant dense<0.000000e+00> : vector<128x32xf32>
    %69 = tpu.matmul %68, %1, %cst_46 {dimension_numbers = #tpu.dot_dimension_numbers<[1], [0], [0], [1], [0, 0, 1, 1], [], []>} : vector<128x8xf32>, vector<8x32xf32>, vector<128x32xf32> -> vector<128x32xf32>
    %70 = arith.subf %59, %69 : vector<128x32xf32>
    %71 = arith.mulf %70, %70 : vector<128x32xf32>
    %72 = vector.shape_cast %71 : vector<128x32xf32> to vector<1x128x32xf32>
    %cst_47 = arith.constant dense<0.000000e+00> : vector<1xf32>
    %73 = vector.multi_reduction <add>, %72, %cst_47 [1, 2] : vector<1x128x32xf32> to vector<1xf32>
    %74 = vector.shape_cast %73 : vector<1xf32> to vector<1x1x1xf32>
    %75 = vector.extract %74[0, 0, 0] : f32 from vector<1x1x1xf32>
    %76 = arith.addf %67, %75 : f32
    %77 = vector.broadcast %76 : f32 to vector<1x8x128xf32>
    %c0_48 = arith.constant 0 : index
    %c0_49 = arith.constant 0 : index
    %c0_50 = arith.constant 0 : index
    %78 = vector.load %arg6[%c0_48, %c0_49, %c0_50] : memref<1x8x128xf32, #tpu.memory_space<vmem>>, vector<1x8x128xf32>
    tpu.vector_store %arg6[%c0_48, %c0_49, %c0_50], %77 {strides = array<i32>} : memref<1x8x128xf32, #tpu.memory_space<vmem>>, vector<1x8x128xf32>,
    return
  }
  func.func @transform_0(%arg0: i32) -> (i32, i32, i32) {
    %c0_i32 = arith.constant 0 : i32
    %c0_i32_0 = arith.constant 0 : i32
    %c0_i32_1 = arith.constant 0 : i32
    return %arg0, %c0_i32, %c0_i32_0 : i32, i32, i32
  }
  func.func @transform_1(%arg0: i32) -> (i32, i32, i32) {
    %c0_i32 = arith.constant 0 : i32
    %c0_i32_0 = arith.constant 0 : i32
    %c0_i32_1 = arith.constant 0 : i32
    return %arg0, %c0_i32, %c0_i32_0 : i32, i32, i32
  }
  func.func @transform_2(%arg0: i32) -> (i32, i32, i32) {
    %c0_i32 = arith.constant 0 : i32
    %c0_i32_0 = arith.constant 0 : i32
    %c0_i32_1 = arith.constant 0 : i32
    return %arg0, %c0_i32, %c0_i32_0 : i32, i32, i32
  }
  func.func @transform_3(%arg0: i32) -> (i32, i32) {
    %c0_i32 = arith.constant 0 : i32
    %c0_i32_0 = arith.constant 0 : i32
    %c0_i32_1 = arith.constant 0 : i32
    return %c0_i32, %c0_i32_0 : i32, i32
  }
  func.func @transform_4(%arg0: i32) -> (i32, i32) {
    %c0_i32 = arith.constant 0 : i32
    %c0_i32_0 = arith.constant 0 : i32
    %c0_i32_1 = arith.constant 0 : i32
    return %c0_i32, %c0_i32_0 : i32, i32
  }
  func.func @transform_5(%arg0: i32) -> (i32, i32, i32) {
    %c0_i32 = arith.constant 0 : i32
    %c0_i32_0 = arith.constant 0 : i32
    %c0_i32_1 = arith.constant 0 : i32
    return %arg0, %c0_i32, %c0_i32_0 : i32, i32, i32
  }
}

</mosaic_0001>

<bundles_post_ra>
// kernel: tpu_custom_call.1
= control target key start
LH: loop header
LB: loop body
LE: loop exit
PB: predicated region body
PF: predicated region fallthrough
CT: control target
= control target key end

     0   :  { %s1914_s0 = inlined_call_operand.hbm [shape: f32[8,32,32], index: 0, kind: input, shape index: {}]   ;;  %s1915_s1 = inlined_call_operand.hbm [shape: f32[8,8,8], index: 1, kind: input, shape index: {}]   ;;  %s1916_s2 = inlined_call_operand.hbm [shape: f32[8,8,8], index: 2, kind: input, shape index: {}]   ;;  %s1917_s3 = inlined_call_operand.vmem [shape: f32[32,8], index: 3, kind: input, shape index: {}]   ;;  %s1918_s4 = inlined_call_operand.vmem [shape: f32[8,32], index: 4, kind: input, shape index: {}]   ;;  %s1919_s5 = inlined_call_operand.hbm [shape: f32[2,8,128], index: 5, kind: output, shape index: {}]  }
   0x1   :  { %1929 = sst [smem:[#allocation18_spill]] %s1915_s1 }
   0x2   :  { %10 = vsyncpa [#allocation5], 0 }
   0x3   :  { %12 = vsyncpa [#allocation5 + $0x1], 0 }
   0x4   :  { %13 = vsyncpa [#allocation8], 0 }
   0x5   :  { %15 = vsyncpa [#allocation8 + $0x1], 0 }
   0x6   :  { %16 = vsyncpa [#allocation6], 0 }
   0x7   :  { %18 = vsyncpa [#allocation6 + $0x1], 0  ;;  %s1537_s18 = smov 0   ;;  %s1539_s19 = smov 0  }
   0x8   :  { %s1541_s20 = smov 0   ;;  %s1543_s21 = smov 0  }
   0x9 LB: > { %1930 = sst [smem:[#allocation14_spill]] %s1499_s20  ;;  %s1558_s22 = sadd.s32 4294967295, %s1503_s21   ;;  %s1503_s21 = sphi %s1543_s21, %s1945_s21   ;;  %s1499_s20 = sphi %s1541_s20, %s1947_s20   ;;  %s1495_s19 = sphi %s1539_s19, %s1949_s19   ;;  %s1491_s18 = sphi %s1537_s18, %s1948_s18  }
   0xa   : > { %1931 = sst [smem:[#allocation15_spill]] %s1503_s21  ;;  %s1183_s23 = sadd.s32 4294967294, %s1503_s21  }
   0xb   : > { %s1562_s24 = sadd.s32 1, %s1503_s21   ;;  %s31_s25 = sadd.s32 1, %s1499_s20 }
   0xc   : > { %1932 = sst [smem:[#allocation16_spill]] %s1562_s24  ;;  %s28_s26 = ssub.s32 %s1503_s21, %s1562_s24 }
   0xd   : > { %p38_p0 = scmp.ne.s32.totalorder %s1499_s20, %s1495_s19  ;;  %p29_p1 = scmp.eq.s32.totalorder %s28_s26, 0 }
   0xe   : > { %p39_p2 = scmp.eq.s32.totalorder %s1503_s21, 0  ;;  %p44_p3 = scmp.ne.s32.totalorder %s1495_s19, %s1491_s18 }
   0xf   : > { %p45_p4 = scmp.eq.s32.totalorder %s1558_s22, 0  ;;  %p162_p7 = scmp.eq.s32.totalorder %s1558_s22, 1 }
  0x10   : > { %s1574_s27 = scalar_select %p29_p1, %s1499_s20, %s31_s25  }
  0x11   : > { %p40_p5 = por %p39_p2, %p38_p0  ;;  %p1576_p6 = por %p45_p4, %p44_p3 }
  0x12   : > { %1933 = sst [smem:[#allocation17_spill]] %s1574_s27  ;;  %p168_p8 = scmp.eq.s32.totalorder %s1183_s23, 1 }
  0x13   : > { %p1307_p10 = scmp.lt.s32.totalorder %s1503_s21, 2  ;;  %p1583_p11 = por %p162_p7, %p38_p0 }
  0x14   : > { %p1587_p12 = por %p168_p8, %p44_p3  ;;  %s1592_s6 = sand.u32 1, %s1499_s20  }
  0x15   : > { %p1594_p13 = pnand %p1307_p10, %p40_p5  ;;  %s217_s8 = sand.u32 1, %s1503_s21  }
  0x16   : > { %s1920_s9 = sshll.u32 %s1592_s6, 5  ;;  %s1277_s10 = sshll.u32 %s1503_s21, 5 }
  0x17   : > { %s1938_s1 = sld [smem:[#allocation18_spill]]  ;;  %s221_s14 = scalar_lea.vmem [#allocation7], %s1920_s9 }
  0x18   : > { %s229_s15 = sshll.u32 %s221_s14, 4  ;;  %s1606_s17 = scalar_lea.sflag [#allocation8], %s217_s8  ;;  %s230_s15 = int_to_ptr.vmem [resolvable:$true] %s229_s15 }
  0x19   : > { %p1347_p1 = pneg %p1594_p13 }
  0x1d   : > { %s226_s13 = scalar_lea.hbm %s1938_s1, %s1277_s10  ;;  %s1350_s12 = scalar_lea.hbm %s1938_s1, 64 }
  0x1e   : > { %s227_s16 = sshll.u32 %s226_s13, 4  ;;  %s228_s16 = int_to_ptr.hbm [resolvable:$true] %s227_s16 }
  0x1f   : > { %s1343_s23 = sshra.s32 %s228_s16, 4  ;;  %s1344_s23 = int_to_ptr.hbm [resolvable:$true] %s1343_s23 }
  0x20   : > { %s1345_s25 = scalar_lea.hbm %s1344_s23, 32  ;;  %p1351_p4 = scmp.lt.s32.totalorder %s1344_s23, %s1938_s1 }
  0x21   : > { %p1346_p0 = scmp.ne.s32.totalorder %s1344_s23, %s1345_s25  ;;  %p1352_p5 = scmp.lt.s32.totalorder %s1350_s12, %s1345_s25 }
  0x23   : > { %p1348_p2 = pnand %p1347_p1, %p1346_p0  ;;  %p1353_p7 = por %p1352_p5, %p1351_p4 }
  0x25   : > { %p1349_p3 = pneg %p1348_p2 }
  0x27   : > { %p1354_p8 = pnand %p1353_p7, %p1349_p3 }
  0x29   : > { %1357 = shalt.err (!%p1354_p8)
}
  0x2a   : > { %s1921_s8 = smov 128   ;;  %s1923_s9 = smov 8  }
  0x2b   : > { %1299 = dma.hbm_to_vmem [thread:$0]  (!%p1594_p13), %s228_s16, 512, %s230_s15, %s1606_s17, %s1921_s8, %s1921_s8, %s1923_s9  }
  0x2c   : > { %s248_s25 = scalar_lea.hbm %s1916_s2, %s1277_s10  ;;  %s1939_s11 = sshll.u32 %s1592_s6, 5 }
  0x2d   : > { %s243_s12 = scalar_lea.vmem [#allocation9], %s1939_s11  ;;  %s249_s13 = sshll.u32 %s248_s25, 4  ;;  %s1632_s13 = int_to_ptr.hbm [resolvable:$true] %s249_s13 }
  0x2e   : > { %s251_s14 = sshll.u32 %s243_s12, 4  ;;  %p1196_p10 = scmp.ge.s32.totalorder %s1503_s21, 1  ;;  %s1630_s14 = int_to_ptr.vmem [resolvable:$true] %s251_s14 }
  0x2f   : > { %p259_p0 = scmp.lt.s32.totalorder %s1503_s21, 3  ;;  %s1186_s1 = sshll.u32 %s1592_s6, 7 }
  0x30   : > { %s1276_s27 = sshll.u32 %s1503_s21, 7  ;;  %s198_s23 = scalar_lea.vmem [#allocation4], %s1186_s1 }
  0x31   : > { %p1638_p2 = pnand %p1196_p10, %p259_p0  ;;  %s204_s26 = scalar_lea.hbm %s1914_s0, %s1276_s27 }
  0x32   : > { %s207_s11 = sshll.u32 %s198_s23, 4  ;;  %s205_s25 = sshll.u32 %s204_s26, 4  ;;  %s208_s11 = int_to_ptr.vmem [resolvable:$true] %s207_s11  ;;  %s206_s25 = int_to_ptr.hbm [resolvable:$true] %s205_s25 }
  0x33   : > { %s195_s12 = scalar_lea.sflag [#allocation5], %s1592_s6  ;;  %s1373_s8 = sshra.s32 %s206_s25, 4  ;;  %s1374_s8 = int_to_ptr.hbm [resolvable:$true] %s1373_s8 }
  0x34   : > { %s1375_s9 = scalar_lea.hbm %s1374_s8, 128  ;;  %s1380_s21 = scalar_lea.hbm %s1914_s0, 256 }
  0x35   : > { %p1376_p3 = scmp.ne.s32.totalorder %s1374_s8, %s1375_s9  ;;  %p1381_p7 = scmp.lt.s32.totalorder %s1374_s8, %s1914_s0 }
  0x36   : > { %p1382_p8 = scmp.lt.s32.totalorder %s1380_s21, %s1375_s9 }
  0x37   : > { %p1378_p4 = pnand %p1376_p3, %p1347_p1 }
  0x38   : > { %p1383_p10 = por %p1382_p8, %p1381_p7 }
  0x39   : > { %p1379_p5 = pneg %p1378_p4 }
  0x3b   : > { %p1384_p0 = pnand %p1383_p10, %p1379_p5 }
  0x3d   : > { %1387 = shalt.err (!%p1384_p0)
}
  0x3e   : > { %s1941_s1 = smov 8   ;;  %s1942_s6 = smov 128  }
  0x3f   : > { %1296 = dma.hbm_to_vmem [thread:$0]  (!%p1594_p13), %s206_s25, 2048, %s208_s11, %s195_s12, %s1942_s6, %s1942_s6, %s1941_s1  }
  0x40   : > { %s1403_s10 = sshra.s32 %s1632_s13, 4  ;;  %s1410_s9 = scalar_lea.hbm %s1916_s2, 64  ;;  %s1404_s10 = int_to_ptr.hbm [resolvable:$true] %s1403_s10 }
  0x41   : > { %s1405_s20 = scalar_lea.hbm %s1404_s10, 32  ;;  %p1411_p5 = scmp.lt.s32.totalorder %s1404_s10, %s1916_s2 }
  0x42   : > { %p1406_p3 = scmp.ne.s32.totalorder %s1404_s10, %s1405_s20  ;;  %p1412_p7 = scmp.lt.s32.totalorder %s1410_s9, %s1405_s20 }
  0x44   : > { %p1408_p4 = pnand %p1406_p3, %p1347_p1  ;;  %p1413_p8 = por %p1412_p7, %p1411_p5 }
  0x46   : > { %p1409_p9 = pneg %p1408_p4 }
  0x48   : > { %p1414_p10 = pnand %p1413_p8, %p1409_p9 }
  0x4a   : > { %1417 = shalt.err (!%p1414_p10)
}
  0x4b   : > { %1302 = dma.hbm_to_vmem [thread:$0]  (!%p1594_p13), %s1632_s13, 512, %s1630_s14, %s1606_s17, %s1942_s6, %s1942_s6, %s1941_s1  }
  0x4c   : > { %263 = sbr.rel (%p1638_p2) target bundleno = 641 (0x281), region = 40  ;;  %s1681_s23 = sand.u32 (!%p1638_p2), 1, %s1495_s19  }
  0x4d   : > { %s1197_s11 = sshll.u32 (!%p1638_p2), %s1681_s23, 7  ;;  %s266_s25 = scalar_lea.sflag (!%p1638_p2), [#allocation5], %s1681_s23 }
  0x4e   : > { %s1685_s12 = scalar_lea.vmem (!%p1638_p2), [#allocation4], %s1197_s11 }
  0x51   : > { %1478 = dma.done.wait (%p1576_p6), %s266_s25, 2048  }
  0x52   : > { %1480 = vsyncadd (%p1576_p6), %s266_s25, 4294965248  ;;  %s275_s7 = sand.u32 1, %s1558_s22   ;;  %s1198_s17 = sshll.u32 %s1681_s23, 5 }
  0x53   : > { %s276_s14 = scalar_lea.sflag [#allocation8], %s275_s7  ;;  %s279_s13 = scalar_lea.vmem [#allocation7], %s1198_s17 }
  0x54   : > { %1482 = dma.done.wait (%p1576_p6), %s276_s14, 1024  }
  0x55   : > { %1484 = vsyncadd (%p1576_p6), %s276_s14, 4294966272  ;;  %vm336_vm0 = vcmask 64512   ;;  %v335_v0 = vld [vmem:[%s279_s13] sm:$0xff]  ;;  %s289_s15 = scalar_lea.vmem [#allocation9], %s1198_s17  ;;  %v1219_v3 = vld [vmem:[%s279_s13 + $0x10] sm:$0xff]  ;;  %vm809_vm1 = vcmask 261120  }
  0x56   : > { %v382_v1 = vld [vmem:[%s289_s15] sm:$0xff]  ;;  %364 = vmatpush.msra.mxu0 %v335_v0  ;;  %v1224_v4 = vld [vmem:[%s289_s15 + $0x10] sm:$0xff]  ;;  %v1209_v5 = vld [vmem:[%s279_s13 + $0x8] sm:$0xff]  ;;  %s1200_s8 = sshll.u32 %s1681_s23, 3  ;;  %s1272_s26 = sshll.u32 %s1558_s22, 3 }
  0x57   : > { %v330_v2 = vld [vmem:[%s1917_s3] sm:$0xff]  ;;  %398 = vmatpush.msra.mxu1 %v382_v1  ;;  %v1214_v6 = vld [vmem:[%s289_s15 + $0x8] sm:$0xff]  ;;  %v1229_v7 = vld [vmem:[%s279_s13 + $0x18] sm:$0xff]  ;;  %433 = vmatpush.msra.mxu2 %v1209_v5  ;;  %s326_s7 = scalar_lea.vmem [#allocation10], %s1200_s8  ;;  %s1055_s27 = scalar_lea.sflag [#allocation6], %s1681_s23 }
  0x58   : > { %1201 = vmatmul.msk.f32.vlgmr.msra.gmra.mxu0 %vm336_vm0, %v330_v2  ;;  %1205 = vmatmul.msk.f32.vlgmr.msra.gmra.mxu1 %vm336_vm0, %v330_v2  ;;  %v1234_v8 = vld [vmem:[%s289_s15 + $0x18] sm:$0xff]  ;;  %v331_v9 = vld [vmem:[%s1917_s3 + $0x8] sm:$0xff]  ;;  %v332_v10 = vld [vmem:[%s1917_s3 + $0x10] sm:$0xff]  ;;  %s1067_s17 = sshll.u32 %s326_s7, 4  ;;  %s1453_s10 = scalar_lea.hbm %s1919_s5, 16  ;;  %s1068_s17 = int_to_ptr.vmem [resolvable:$true] %s1067_s17 }
  0x59   : > { %505 = vmatpush.msrb.mxu0 %v1219_v3  ;;  %541 = vmatpush.msrb.mxu1 %v1224_v4  ;;  %v333_v11 = vld [vmem:[%s1917_s3 + $0x18] sm:$0xff]  ;;  %v334_v12 = vld [vmem:[%s1918_s4] sm:$0xff] }
  0x5a   : > { %469 = vmatpush.msra.mxu3 %v1214_v6  ;;  %1210 = vmatmul.msk.f32.vlgmr.msra.gmra.mxu2 %vm336_vm0, %v330_v2 }
  0x5b   : > { %1215 = vmatmul.msk.f32.vlgmr.msra.gmra.mxu3 %vm336_vm0, %v330_v2  ;;  %577 = vmatpush.msrb.mxu2 %v1229_v7 }
  0x5c   : > { %613 = vmatpush.msrb.mxu3 %v1234_v8  ;;  %727 = vmatpush.msra.mxu0 %v334_v12 }
  0x5d   : > { %929 = vmatpush.msra.mxu1 %v334_v12  ;;  %1279 = vmatpush.msra.mxu2 %v334_v12 }
  0x5e   : > { %1280 = vmatpush.msra.mxu3 %v334_v12 }
  0x60   : > { %1202 = vmatmul.msk.f32.gmra.mxu0 %vm336_vm0, %v331_v9  ;;  %1206 = vmatmul.msk.f32.gmra.mxu1 %vm336_vm0, %v331_v9 }
  0x62   : > { %1211 = vmatmul.msk.f32.gmra.mxu2 %vm336_vm0, %v331_v9 }
  0x63   : > { %1216 = vmatmul.msk.f32.gmra.mxu3 %vm336_vm0, %v331_v9 }
  0x68   : > { %1203 = vmatmul.msk.f32.gmra.mxu0 %vm336_vm0, %v332_v10  ;;  %1207 = vmatmul.msk.f32.gmra.mxu1 %vm336_vm0, %v332_v10 }
  0x6a   : > { %1212 = vmatmul.msk.f32.gmra.mxu2 %vm336_vm0, %v332_v10 }
  0x6b   : > { %1217 = vmatmul.msk.f32.gmra.mxu3 %vm336_vm0, %v332_v10 }
  0x70   : > { %1204 = vmatmul.msk.f32.gmra.mxu0 %vm336_vm0, %v333_v11  ;;  %1208 = vmatmul.msk.f32.gmra.mxu1 %vm336_vm0, %v333_v11 }
  0x72   : > { %1213 = vmatmul.msk.f32.gmra.mxu2 %vm336_vm0, %v333_v11 }
  0x73   : > { %1218 = vmatmul.msk.f32.gmra.mxu3 %vm336_vm0, %v333_v11 }
  0x78   : > { %1220 = vmatmul.msk.f32.vlgmr.msrb.gmra.mxu0 %vm336_vm0, %v330_v2  ;;  %1225 = vmatmul.msk.f32.vlgmr.msrb.gmra.mxu1 %vm336_vm0, %v330_v2 }
  0x7a   : > { %1230 = vmatmul.msk.f32.vlgmr.msrb.gmra.mxu2 %vm336_vm0, %v330_v2 }
  0x7b   : > { %1235 = vmatmul.msk.f32.vlgmr.msrb.gmra.mxu3 %vm336_vm0, %v330_v2 }
  0x80   : > { %1221 = vmatmul.msk.f32.gmra.mxu0 %vm336_vm0, %v331_v9  ;;  %1226 = vmatmul.msk.f32.gmra.mxu1 %vm336_vm0, %v331_v9 }
  0x82   : > { %1231 = vmatmul.msk.f32.gmra.mxu2 %vm336_vm0, %v331_v9 }
  0x83   : > { %1236 = vmatmul.msk.f32.gmra.mxu3 %vm336_vm0, %v331_v9 }
  0x88   : > { %1222 = vmatmul.msk.f32.gmra.mxu0 %vm336_vm0, %v332_v10  ;;  %1227 = vmatmul.msk.f32.gmra.mxu1 %vm336_vm0, %v332_v10 }
  0x8a   : > { %1232 = vmatmul.msk.f32.gmra.mxu2 %vm336_vm0, %v332_v10 }
  0x8b   : > { %1237 = vmatmul.msk.f32.gmra.mxu3 %vm336_vm0, %v332_v10 }
  0x90   : > { %1223 = vmatmul.msk.f32.gmra.mxu0 %vm336_vm0, %v333_v11  ;;  %1228 = vmatmul.msk.f32.gmra.mxu1 %vm336_vm0, %v333_v11 }
  0x92   : > { %1233 = vmatmul.msk.f32.gmra.mxu2 %vm336_vm0, %v333_v11 }
  0x93   : > { %1238 = vmatmul.msk.f32.gmra.mxu3 %vm336_vm0, %v333_v11 }
  0xd5   : > { %v366_v13 = vpop.f32.mrf.mxu0  ;;  %v400_v14 = vpop.f32.mrf.mxu1 }
  0xd6   : > { %378 = vst.msk [vmem:[#allocation2] sm:$0xff] %vm336_vm0, %v366_v13 }
  0xd7   : > { %412 = vst.msk [vmem:[#allocation3] sm:$0xff] %vm336_vm0, %v400_v14 }
  0xdd   : > { %v369_v15 = vpop.f32.mrf.mxu0  ;;  %v403_v16 = vpop.f32.mrf.mxu1  ;;  %v648_v17 = vld [vmem:[#allocation2] sm:$0xff] }
  0xde   : > { %379 = vst.msk [vmem:[#allocation2 + $0x8] sm:$0xff] %vm336_vm0, %v369_v15  ;;  %1239 = vmatmul.msk.f32.vlgmr.msra.gmra.mxu0 %vm336_vm0, %v648_v17  ;;  %v850_v18 = vld [vmem:[#allocation3] sm:$0xff]  ;;  %v435_v19 = vpop.f32.mrf.mxu2  ;;  %v471_v20 = vpop.f32.mrf.mxu3 }
  0xdf   : > { %413 = vst.msk [vmem:[#allocation3 + $0x8] sm:$0xff] %vm336_vm0, %v403_v16  ;;  %1255 = vmatmul.msk.f32.vlgmr.msra.gmra.mxu1 %vm336_vm0, %v850_v18 }
  0xe0   : > { %448 = vst.msk [vmem:[#allocation2 + $0x20] sm:$0xff] %vm336_vm0, %v435_v19 }
  0xe1   : > { %484 = vst.msk [vmem:[#allocation3 + $0x20] sm:$0xff] %vm336_vm0, %v471_v20 }
  0xe5   : > { %v372_v21 = vpop.f32.mrf.mxu0  ;;  %v406_v22 = vpop.f32.mrf.mxu1  ;;  %v649_v23 = vld [vmem:[#allocation2 + $0x8] sm:$0xff] }
  0xe6   : > { %380 = vst.msk [vmem:[#allocation2 + $0x10] sm:$0xff] %vm336_vm0, %v372_v21  ;;  %1240 = vmatmul.msk.f32.gmra.mxu0 %vm336_vm0, %v649_v23  ;;  %v851_v24 = vld [vmem:[#allocation3 + $0x8] sm:$0xff]  ;;  %v438_v25 = vpop.f32.mrf.mxu2  ;;  %v474_v26 = vpop.f32.mrf.mxu3 }
  0xe7   : > { %414 = vst.msk [vmem:[#allocation3 + $0x10] sm:$0xff] %vm336_vm0, %v406_v22  ;;  %1256 = vmatmul.msk.f32.gmra.mxu1 %vm336_vm0, %v851_v24  ;;  %v652_v39 = vld [vmem:[#allocation2 + $0x20] sm:$0xff] }
  0xe8   : > { %449 = vst.msk [vmem:[#allocation2 + $0x28] sm:$0xff] %vm336_vm0, %v438_v25  ;;  %v854_v40 = vld [vmem:[#allocation3 + $0x20] sm:$0xff] }
  0xe9   : > { %485 = vst.msk [vmem:[#allocation3 + $0x28] sm:$0xff] %vm336_vm0, %v474_v26 }
  0xed   : > { %v375_v27 = vpop.f32.mrf.mxu0  ;;  %v409_v28 = vpop.f32.mrf.mxu1  ;;  %v650_v29 = vld [vmem:[#allocation2 + $0x10] sm:$0xff] }
  0xee   : > { %381 = vst.msk [vmem:[#allocation2 + $0x18] sm:$0xff] %vm336_vm0, %v375_v27  ;;  %1241 = vmatmul.msk.f32.gmra.mxu0 %vm336_vm0, %v650_v29  ;;  %v852_v30 = vld [vmem:[#allocation3 + $0x10] sm:$0xff]  ;;  %v441_v31 = vpop.f32.mrf.mxu2  ;;  %v477_v32 = vpop.f32.mrf.mxu3 }
  0xef   : > { %415 = vst.msk [vmem:[#allocation3 + $0x18] sm:$0xff] %vm336_vm0, %v409_v28  ;;  %1257 = vmatmul.msk.f32.gmra.mxu1 %vm336_vm0, %v852_v30  ;;  %v653_v47 = vld [vmem:[#allocation2 + $0x28] sm:$0xff]  ;;  %v632_v30 = vld [vmem:[%s1685_s12] sm:$0xff] }
  0xf0   : > { %450 = vst.msk [vmem:[#allocation2 + $0x30] sm:$0xff] %vm336_vm0, %v441_v31  ;;  %v855_v48 = vld [vmem:[#allocation3 + $0x28] sm:$0xff]  ;;  %v634_v31 = vld [vmem:[%s1685_s12 + $0x10] sm:$0xff] }
  0xf1   : > { %486 = vst.msk [vmem:[#allocation3 + $0x30] sm:$0xff] %vm336_vm0, %v477_v32  ;;  %v633_v28 = vld [vmem:[%s1685_s12 + $0x8] sm:$0xff] }
  0xf5   : > { %v507_v33 = vpop.f32.mrf.mxu0  ;;  %v543_v34 = vpop.f32.mrf.mxu1  ;;  %v651_v35 = vld [vmem:[#allocation2 + $0x18] sm:$0xff] }
  0xf6   : > { %520 = vst.msk [vmem:[#allocation2 + $0x40] sm:$0xff] %vm336_vm0, %v507_v33  ;;  %1242 = vmatmul.msk.f32.gmra.mxu0 %vm336_vm0, %v651_v35  ;;  %v853_v36 = vld [vmem:[#allocation3 + $0x18] sm:$0xff]  ;;  %v444_v37 = vpop.f32.mrf.mxu2  ;;  %v480_v38 = vpop.f32.mrf.mxu3 }
  0xf7   : > { %556 = vst.msk [vmem:[#allocation3 + $0x40] sm:$0xff] %vm336_vm0, %v543_v34  ;;  %1258 = vmatmul.msk.f32.gmra.mxu1 %vm336_vm0, %v853_v36  ;;  %v654_v55 = vld [vmem:[#allocation2 + $0x30] sm:$0xff]  ;;  %v635_v34 = vld [vmem:[%s1685_s12 + $0x18] sm:$0xff] }
  0xf8   : > { %451 = vst.msk [vmem:[#allocation2 + $0x38] sm:$0xff] %vm336_vm0, %v444_v37  ;;  %v856_v56 = vld [vmem:[#allocation3 + $0x30] sm:$0xff] }
  0xf9   : > { %487 = vst.msk [vmem:[#allocation3 + $0x38] sm:$0xff] %vm336_vm0, %v480_v38 }
  0xfd   : > { %v510_v41 = vpop.f32.mrf.mxu0  ;;  %v546_v42 = vpop.f32.mrf.mxu1  ;;  %v656_v43 = vld [vmem:[#allocation2 + $0x40] sm:$0xff] }
  0xfe   : > { %521 = vst.msk [vmem:[#allocation2 + $0x48] sm:$0xff] %vm336_vm0, %v510_v41  ;;  %1243 = vmatmul.msk.f32.gmra.mxu0 %vm336_vm0, %v652_v39  ;;  %1247 = vmatmul.msk.f32.vlgmr.msra.gmra.mxu2 %vm336_vm0, %v656_v43  ;;  %v858_v44 = vld [vmem:[#allocation3 + $0x40] sm:$0xff]  ;;  %v579_v45 = vpop.f32.mrf.mxu2  ;;  %v615_v46 = vpop.f32.mrf.mxu3 }
  0xff   : > { %557 = vst.msk [vmem:[#allocation3 + $0x48] sm:$0xff] %vm336_vm0, %v546_v42  ;;  %1259 = vmatmul.msk.f32.gmra.mxu1 %vm336_vm0, %v854_v40  ;;  %1263 = vmatmul.msk.f32.vlgmr.msra.gmra.mxu3 %vm336_vm0, %v858_v44  ;;  %v655_v63 = vld [vmem:[#allocation2 + $0x38] sm:$0xff]  ;;  %v636_v39 = vld [vmem:[%s1685_s12 + $0x20] sm:$0xff]  ;;  %v637_v42 = vld [vmem:[%s1685_s12 + $0x28] sm:$0xff] }
 0x100   : > { %592 = vst.msk [vmem:[#allocation2 + $0x60] sm:$0xff] %vm336_vm0, %v579_v45  ;;  %v857_v0 = vld [vmem:[#allocation3 + $0x38] sm:$0xff] }
 0x101   : > { %628 = vst.msk [vmem:[#allocation3 + $0x60] sm:$0xff] %vm336_vm0, %v615_v46 }
 0x105   : > { %v513_v49 = vpop.f32.mrf.mxu0  ;;  %v549_v50 = vpop.f32.mrf.mxu1  ;;  %v657_v51 = vld [vmem:[#allocation2 + $0x48] sm:$0xff] }
 0x106   : > { %522 = vst.msk [vmem:[#allocation2 + $0x50] sm:$0xff] %vm336_vm0, %v513_v49  ;;  %1244 = vmatmul.msk.f32.gmra.mxu0 %vm336_vm0, %v653_v47  ;;  %1248 = vmatmul.msk.f32.gmra.mxu2 %vm336_vm0, %v657_v51  ;;  %v859_v52 = vld [vmem:[#allocation3 + $0x48] sm:$0xff]  ;;  %v582_v53 = vpop.f32.mrf.mxu2  ;;  %v618_v54 = vpop.f32.mrf.mxu3 }
 0x107   : > { %558 = vst.msk [vmem:[#allocation3 + $0x50] sm:$0xff] %vm336_vm0, %v549_v50  ;;  %1260 = vmatmul.msk.f32.gmra.mxu1 %vm336_vm0, %v855_v48  ;;  %1264 = vmatmul.msk.f32.gmra.mxu3 %vm336_vm0, %v859_v52  ;;  %v660_v5 = vld [vmem:[#allocation2 + $0x60] sm:$0xff]  ;;  %v638_v48 = vld [vmem:[%s1685_s12 + $0x30] sm:$0xff] }
 0x108   : > { %593 = vst.msk [vmem:[#allocation2 + $0x68] sm:$0xff] %vm336_vm0, %v582_v53  ;;  %v862_v6 = vld [vmem:[#allocation3 + $0x60] sm:$0xff] }
 0x109   : > { %629 = vst.msk [vmem:[#allocation3 + $0x68] sm:$0xff] %vm336_vm0, %v618_v54  ;;  %v639_v54 = vld [vmem:[%s1685_s12 + $0x38] sm:$0xff] }
 0x10d   : > { %v516_v57 = vpop.f32.mrf.mxu0  ;;  %v552_v58 = vpop.f32.mrf.mxu1  ;;  %v658_v59 = vld [vmem:[#allocation2 + $0x50] sm:$0xff] }
 0x10e   : > { %523 = vst.msk [vmem:[#allocation2 + $0x58] sm:$0xff] %vm336_vm0, %v516_v57  ;;  %1245 = vmatmul.msk.f32.gmra.mxu0 %vm336_vm0, %v654_v55  ;;  %1249 = vmatmul.msk.f32.gmra.mxu2 %vm336_vm0, %v658_v59  ;;  %v860_v60 = vld [vmem:[#allocation3 + $0x50] sm:$0xff]  ;;  %v585_v61 = vpop.f32.mrf.mxu2  ;;  %v621_v62 = vpop.f32.mrf.mxu3 }
 0x10f   : > { %559 = vst.msk [vmem:[#allocation3 + $0x58] sm:$0xff] %vm336_vm0, %v552_v58  ;;  %1261 = vmatmul.msk.f32.gmra.mxu1 %vm336_vm0, %v856_v56  ;;  %1265 = vmatmul.msk.f32.gmra.mxu3 %vm336_vm0, %v860_v60  ;;  %v661_v7 = vld [vmem:[#allocation2 + $0x68] sm:$0xff] }
 0x110   : > { %594 = vst.msk [vmem:[#allocation2 + $0x70] sm:$0xff] %vm336_vm0, %v585_v61  ;;  %v863_v8 = vld [vmem:[#allocation3 + $0x68] sm:$0xff] }
 0x111   : > { %630 = vst.msk [vmem:[#allocation3 + $0x70] sm:$0xff] %vm336_vm0, %v621_v62 }
 0x115   : > { %v659_v1 = vld [vmem:[#allocation2 + $0x58] sm:$0xff] }
 0x116   : > { %1246 = vmatmul.msk.f32.gmra.mxu0 %vm336_vm0, %v655_v63  ;;  %1250 = vmatmul.msk.f32.gmra.mxu2 %vm336_vm0, %v659_v1  ;;  %v861_v2 = vld [vmem:[#allocation3 + $0x58] sm:$0xff]  ;;  %v588_v3 = vpop.f32.mrf.mxu2  ;;  %v624_v4 = vpop.f32.mrf.mxu3 }
 0x117   : > { %1262 = vmatmul.msk.f32.gmra.mxu1 %vm336_vm0, %v857_v0  ;;  %1266 = vmatmul.msk.f32.gmra.mxu3 %vm336_vm0, %v861_v2  ;;  %595 = vst.msk [vmem:[#allocation2 + $0x78] sm:$0xff] %vm336_vm0, %v588_v3  ;;  %v662_v9 = vld [vmem:[#allocation2 + $0x70] sm:$0xff] }
 0x118   : > { %631 = vst.msk [vmem:[#allocation3 + $0x78] sm:$0xff] %vm336_vm0, %v624_v4  ;;  %v864_v10 = vld [vmem:[#allocation3 + $0x70] sm:$0xff] }
 0x11e   : > { %1251 = vmatmul.msk.f32.gmra.mxu2 %vm336_vm0, %v660_v5  ;;  %v663_v11 = vld [vmem:[#allocation2 + $0x78] sm:$0xff] }
 0x11f   : > { %1267 = vmatmul.msk.f32.gmra.mxu3 %vm336_vm0, %v862_v6  ;;  %v865_v12 = vld [vmem:[#allocation3 + $0x78] sm:$0xff] }
 0x126   : > { %1252 = vmatmul.msk.f32.gmra.mxu2 %vm336_vm0, %v661_v7 }
 0x127   : > { %1268 = vmatmul.msk.f32.gmra.mxu3 %vm336_vm0, %v863_v8 }
 0x12e   : > { %1253 = vmatmul.msk.f32.gmra.mxu2 %vm336_vm0, %v662_v9 }
 0x12f   : > { %1269 = vmatmul.msk.f32.gmra.mxu3 %vm336_vm0, %v864_v10 }
 0x136   : > { %1254 = vmatmul.msk.f32.gmra.mxu2 %vm336_vm0, %v663_v11 }
 0x137   : > { %1270 = vmatmul.msk.f32.gmra.mxu3 %vm336_vm0, %v865_v12 }
 0x15b   : > { %v729_v13 = vpop.f32.mrf.mxu0 }
 0x15c   : > { %v931_v14 = vpop.f32.mrf.mxu1  ;;  %v777_v36 = vsub.f32 %v632_v30, %v729_v13  ;;  %v640_v13 = vld [vmem:[%s1685_s12 + $0x40] sm:$0xff] }
 0x15d   : > { %v979_v46 = vsub.f32 %v632_v30, %v931_v14 }
 0x15e   : > { %v793_v43 = vmul.f32 %v777_v36, %v777_v36 }
 0x15f   : > { %v995_v62 = vmul.f32 %v979_v46, %v979_v46  ;;  %v642_v46 = vld [vmem:[%s1685_s12 + $0x50] sm:$0xff] }
 0x160   : > { %v810_v57 = vsel %vm809_vm1, %v793_v43, 0.0 }
 0x161   : > { %v1011_v10 = vsel %vm809_vm1, %v995_v62, 0.0  ;;  %v644_v62 = vld [vmem:[%s1685_s12 + $0x60] sm:$0xff] }
 0x163   : > { %v732_v15 = vpop.f32.mrf.mxu0 }
 0x164   : > { %v934_v16 = vpop.f32.mrf.mxu1  ;;  %v778_v33 = vsub.f32 %v633_v28, %v732_v15 }
 0x165   : > { %v980_v47 = vsub.f32 %v633_v28, %v934_v16 }
 0x166   : > { %v794_v40 = vmul.f32 %v778_v33, %v778_v33 }
 0x167   : > { %v996_v0 = vmul.f32 %v980_v47, %v980_v47 }
 0x168   : > { %v811_v50 = vsel %vm809_vm1, %v794_v40, 0.0 }
 0x169   : > { %v812_v63 = vadd.f32 %v811_v50, %v810_v57  ;;  %v1012_v11 = vsel %vm809_vm1, %v996_v0, 0.0 }
 0x16b   : > { %v735_v17 = vpop.f32.mrf.mxu0 }
 0x16c   : > { %v937_v18 = vpop.f32.mrf.mxu1  ;;  %v779_v37 = vsub.f32 %v634_v31, %v735_v17 }
 0x16d   : > { %v981_v53 = vsub.f32 %v634_v31, %v937_v18 }
 0x16e   : > { %v795_v44 = vmul.f32 %v779_v37, %v779_v37 }
 0x16f   : > { %v997_v6 = vmul.f32 %v981_v53, %v981_v53 }
 0x170   : > { %v813_v58 = vsel %vm809_vm1, %v795_v44, 0.0 }
 0x171   : > { %v814_v5 = vadd.f32 %v813_v58, %v812_v63  ;;  %v1014_v18 = vsel %vm809_vm1, %v997_v6, 0.0 }
 0x173   : > { %v738_v19 = vpop.f32.mrf.mxu0 }
 0x174   : > { %v940_v20 = vpop.f32.mrf.mxu1  ;;  %v780_v41 = vsub.f32 %v635_v34, %v738_v19 }
 0x175   : > { %v982_v2 = vsub.f32 %v635_v34, %v940_v20  ;;  %v641_v34 = vld [vmem:[%s1685_s12 + $0x48] sm:$0xff] }
 0x176   : > { %v796_v51 = vmul.f32 %v780_v41, %v780_v41 }
 0x177   : > { %v998_v14 = vmul.f32 %v982_v2, %v982_v2  ;;  %v645_v2 = vld [vmem:[%s1685_s12 + $0x68] sm:$0xff] }
 0x178   : > { %v815_v1 = vsel %vm809_vm1, %v796_v51, 0.0 }
 0x179   : > { %v816_v12 = vadd.f32 %v815_v1, %v814_v5  ;;  %v1016_v36 = vsel %vm809_vm1, %v998_v14, 0.0 }
 0x17b   : > { %v741_v21 = vpop.f32.mrf.mxu0 }
 0x17c   : > { %v943_v24 = vpop.f32.mrf.mxu1  ;;  %v781_v45 = vsub.f32 %v636_v39, %v741_v21 }
 0x17d   : > { %v983_v8 = vsub.f32 %v636_v39, %v943_v24 }
 0x17e   : > { %v797_v59 = vmul.f32 %v781_v45, %v781_v45 }
 0x180   : > { %v817_v7 = vsel %vm809_vm1, %v797_v59, 0.0 }
 0x181   : > { %v1808_v22 = vpop.f32.mrf.mxu2  ;;  %v818_v19 = vadd.f32 %v817_v7, %v816_v12 }
 0x182   : > { %v1810_v23 = vpop.f32.mrf.mxu3  ;;  %v785_v24 = vsub.f32 %v640_v13, %v1808_v22 }
 0x183   : > { %v744_v25 = vpop.f32.mrf.mxu0  ;;  %v987_v51 = vsub.f32 %v640_v13, %v1810_v23 }
 0x184   : > { %v946_v29 = vpop.f32.mrf.mxu1  ;;  %v782_v52 = vsub.f32 %v637_v42, %v744_v25  ;;  %v999_v25 = vmul.f32 %v983_v8, %v983_v8  ;;  %v801_v43 = vmul.f32 %v785_v24, %v785_v24  ;;  %v646_v8 = vld [vmem:[%s1685_s12 + $0x70] sm:$0xff] }
 0x185   : > { %v984_v16 = vsub.f32 %v637_v42, %v946_v29  ;;  %v1003_v0 = vmul.f32 %v987_v51, %v987_v51 }
 0x186   : > { %v798_v3 = vmul.f32 %v782_v52, %v782_v52  ;;  %v1018_v42 = vsel %vm809_vm1, %v999_v25, 0.0  ;;  %v825_v53 = vsel %vm809_vm1, %v801_v43, 0.0 }
 0x187   : > { %v1000_v29 = vmul.f32 %v984_v16, %v984_v16 }
 0x188   : > { %v819_v15 = vsel %vm809_vm1, %v798_v3, 0.0 }
 0x189   : > { %v1812_v26 = vpop.f32.mrf.mxu2  ;;  %v820_v33 = vadd.f32 %v819_v15, %v818_v19 }
 0x18a   : > { %v1814_v27 = vpop.f32.mrf.mxu3  ;;  %v786_v22 = vsub.f32 %v641_v34, %v1812_v26 }
 0x18b   : > { %v747_v32 = vpop.f32.mrf.mxu0  ;;  %v988_v1 = vsub.f32 %v641_v34, %v1814_v27  ;;  %v647_v34 = vld [vmem:[%s1685_s12 + $0x78] sm:$0xff] }
 0x18c   : > { %v949_v49 = vpop.f32.mrf.mxu1  ;;  %v783_v60 = vsub.f32 %v638_v48, %v747_v32  ;;  %v1013_v32 = vadd.f32 %v1012_v11, %v1011_v10  ;;  %v1026_v11 = vsel %vm809_vm1, %v1003_v0, 0.0 }
 0x18d   : > { %v985_v30 = vsub.f32 %v638_v48, %v949_v49  ;;  %v1020_v48 = vsel %vm809_vm1, %v1000_v29, 0.0  ;;  %v1004_v12 = vmul.f32 %v988_v1, %v988_v1 }
 0x18e   : > { %v799_v9 = vmul.f32 %v783_v60, %v783_v60  ;;  %v1015_v40 = vadd.f32 %v1014_v18, %v1013_v32  ;;  %v643_v60 = vld [vmem:[%s1685_s12 + $0x58] sm:$0xff]  ;;  %s1065_s12 = scalar_lea.hbm %s1919_s5, %s1272_s26 }
 0x18f   : > { %v1001_v44 = vmul.f32 %v985_v30, %v985_v30  ;;  %s1069_s13 = sshll.u32 %s1065_s12, 4  ;;  %s1070_s13 = int_to_ptr.hbm [resolvable:$true] %s1069_s13 }
 0x190   : > { %v821_v28 = vsel %vm809_vm1, %v799_v9, 0.0  ;;  %v1017_v45 = vadd.f32 %v1016_v36, %v1015_v40  ;;  %s1447_s28 = sshra.s32 %s1070_s13, 4  ;;  %s1448_s28 = int_to_ptr.hbm [resolvable:$true] %s1447_s28 }
 0x191   : > { %v1820_v35 = vpop.f32.mrf.mxu2  ;;  %v822_v41 = vadd.f32 %v821_v28, %v820_v33  ;;  %s1449_s1 = scalar_lea.hbm %s1448_s28, 8  ;;  %p1454_p1 = scmp.lt.s32.totalorder %s1448_s28, %s1919_s5 }
 0x192   : > { %v1822_v38 = vpop.f32.mrf.mxu3  ;;  %v1019_v50 = vadd.f32 %v1018_v42, %v1017_v45  ;;  %v787_v26 = vsub.f32 %v642_v46, %v1820_v35  ;;  %p1450_p6 = scmp.ne.s32.totalorder %s1448_s28, %s1449_s1  ;;  %p1455_p2 = scmp.lt.s32.totalorder %s1453_s10, %s1449_s1 }
 0x193   : > { %v750_v55 = vpop.f32.mrf.mxu0  ;;  %v989_v9 = vsub.f32 %v642_v46, %v1822_v38  ;;  %v1028_v38 = vsel %vm809_vm1, %v1004_v12, 0.0 }
 0x194   : > { %v784_v4 = vsub.f32 %v639_v54, %v750_v55  ;;  %v952_v20 = vpop.f32.mrf.mxu1  ;;  %v1022_v55 = vsel %vm809_vm1, %v1001_v44, 0.0  ;;  %v1021_v58 = vadd.f32 %v1020_v48, %v1019_v50  ;;  %p1451_p9 = pnand %p1450_p6, %p1583_p11  ;;  %p1456_p0 = por %p1455_p2, %p1454_p1 }
 0x195   : > { %v986_v39 = vsub.f32 %v639_v54, %v952_v20  ;;  %v802_v54 = vmul.f32 %v786_v22, %v786_v22  ;;  %v1005_v19 = vmul.f32 %v989_v9, %v989_v9 }
 0x196   : > { %v800_v17 = vmul.f32 %v784_v4, %v784_v4  ;;  %v1023_v23 = vadd.f32 %v1022_v55, %v1021_v58  ;;  %v803_v4 = vmul.f32 %v787_v26, %v787_v26  ;;  %p1452_p13 = pneg %p1451_p9 }
 0x197   : > { %v1002_v49 = vmul.f32 %v986_v39, %v986_v39  ;;  %v827_v3 = vsel %vm809_vm1, %v802_v54, 0.0  ;;  %v1030_v36 = vsel %vm809_vm1, %v1005_v19, 0.0 }
 0x198   : > { %v823_v37 = vsel %vm809_vm1, %v800_v17, 0.0  ;;  %v829_v27 = vsel %vm809_vm1, %v803_v4, 0.0  ;;  %p1457_p3 = pnand %p1456_p0, %p1452_p13 }
 0x199   : > { %v1829_v56 = vpop.f32.mrf.mxu2  ;;  %v824_v47 = vadd.f32 %v823_v37, %v822_v41  ;;  %v1024_v63 = vsel %vm809_vm1, %v1002_v49, 0.0 }
 0x19a   : > { %v1833_v61 = vpop.f32.mrf.mxu3  ;;  %v788_v5 = vsub.f32 %v643_v60, %v1829_v56  ;;  %v1025_v35 = vadd.f32 %v1024_v63, %v1023_v23 }
 0x19b   : > { %v826_v59 = vadd.f32 %v825_v53, %v824_v47  ;;  %v990_v20 = vsub.f32 %v643_v60, %v1833_v61 }
 0x19c   : > { %v804_v14 = vmul.f32 %v788_v5, %v788_v5  ;;  %v1027_v18 = vadd.f32 %v1026_v11, %v1025_v35 }
 0x19d   : > { %v828_v7 = vadd.f32 %v827_v3, %v826_v59  ;;  %v1006_v29 = vmul.f32 %v990_v20, %v990_v20 }
 0x19e   : > { %v831_v25 = vsel %vm809_vm1, %v804_v14, 0.0  ;;  %v1029_v33 = vadd.f32 %v1028_v38, %v1027_v18 }
 0x19f   : > { %v830_v56 = vadd.f32 %v829_v27, %v828_v7  ;;  %v1032_v46 = vsel %vm809_vm1, %v1006_v29, 0.0 }
 0x1a0   : > { %v1031_v45 = vadd.f32 %v1030_v36, %v1029_v33 }
 0x1a1   : > { %v765_v21 = vpop.f32.mrf.mxu2  ;;  %v832_v32 = vadd.f32 %v831_v25, %v830_v56 }
 0x1a2   : > { %v967_v31 = vpop.f32.mrf.mxu3  ;;  %v789_v6 = vsub.f32 %v644_v62, %v765_v21  ;;  %v1033_v54 = vadd.f32 %v1032_v46, %v1031_v45 }
 0x1a3   : > { %v991_v28 = vsub.f32 %v644_v62, %v967_v31 }
 0x1a4   : > { %v805_v15 = vmul.f32 %v789_v6, %v789_v6 }
 0x1a5   : > { %v1007_v41 = vmul.f32 %v991_v28, %v991_v28 }
 0x1a6   : > { %v833_v24 = vsel %vm809_vm1, %v805_v15, 0.0 }
 0x1a7   : > { %v834_v40 = vadd.f32 %v833_v24, %v832_v32  ;;  %v1034_v51 = vsel %vm809_vm1, %v1007_v41, 0.0 }
 0x1a8   : > { %v1035_v58 = vadd.f32 %v1034_v51, %v1033_v54 }
 0x1a9   : > { %v768_v52 = vpop.f32.mrf.mxu2 }
 0x1aa   : > { %v970_v57 = vpop.f32.mrf.mxu3  ;;  %v790_v10 = vsub.f32 %v645_v2, %v768_v52 }
 0x1ab   : > { %v992_v39 = vsub.f32 %v645_v2, %v970_v57 }
 0x1ac   : > { %v806_v21 = vmul.f32 %v790_v10, %v790_v10 }
 0x1ad   : > { %v1008_v47 = vmul.f32 %v992_v39, %v992_v39 }
 0x1ae   : > { %v835_v37 = vsel %vm809_vm1, %v806_v21, 0.0 }
 0x1af   : > { %v836_v31 = vadd.f32 %v835_v37, %v834_v40  ;;  %v1036_v26 = vsel %vm809_vm1, %v1008_v47, 0.0 }
 0x1b0   : > { %v1037_v60 = vadd.f32 %v1036_v26, %v1035_v58 }
 0x1b1   : > { %v771_v13 = vpop.f32.mrf.mxu2 }
 0x1b2   : > { %v791_v16 = vsub.f32 %v646_v8, %v771_v13  ;;  %v973_v17 = vpop.f32.mrf.mxu3 }
 0x1b3   : > { %v993_v42 = vsub.f32 %v646_v8, %v973_v17 }
 0x1b4   : > { %v807_v30 = vmul.f32 %v791_v16, %v791_v16 }
 0x1b5   : > { %v1009_v52 = vmul.f32 %v993_v42, %v993_v42 }
 0x1b6   : > { %v837_v44 = vsel %vm809_vm1, %v807_v30, 0.0 }
 0x1b7   : > { %v838_v50 = vadd.f32 %v837_v44, %v836_v31  ;;  %v1038_v59 = vsel %vm809_vm1, %v1009_v52, 0.0 }
 0x1b8   : > { %v1039_v63 = vadd.f32 %v1038_v59, %v1037_v60 }
 0x1b9   : > { %v774_v61 = vpop.f32.mrf.mxu2 }
 0x1ba   : > { %v792_v43 = vsub.f32 %v647_v34, %v774_v61  ;;  %v976_v22 = vpop.f32.mrf.mxu3 }
 0x1bb   : > { %v994_v49 = vsub.f32 %v647_v34, %v976_v22 }
 0x1bc   : > { %v808_v48 = vmul.f32 %v792_v43, %v792_v43 }
 0x1bd   : > { %v1010_v57 = vmul.f32 %v994_v49, %v994_v49 }
 0x1be   : > { %v839_v53 = vsel %vm809_vm1, %v808_v48, 0.0 }
 0x1bf   : > { %v840_v55 = vadd.f32 %v839_v53, %v838_v50  ;;  %v1040_v62 = vsel %vm809_vm1, %v1010_v57, 0.0 }
 0x1c0   : > { %v1041_v0 = vadd.f32 %v1040_v62, %v1039_v63 }
 0x1c1   : > { %841 = vadd.xlane.f32.xlu0 %v840_v55 }
 0x1c9   : > { %1042 = vadd.xlane.f32.xlu0 %v1041_v0 }
 0x234   : > { %v842_v1 = vpop.xlane.xlu0 %841 }
 0x235   : > { %v843_v23 = vrot.slane %v842_v1, 4 }
 0x237   : > { %v844_v2 = vadd.f32 %v843_v23, %v842_v1 }
 0x239   : > { %v845_v3 = vrot.slane %v844_v2, 2 }
 0x23b   : > { %v846_v4 = vadd.f32 %v845_v3, %v844_v2 }
 0x23c   : > { %v1043_v5 = vpop.xlane.xlu0 %1042 }
 0x23d   : > { %v1044_v6 = vrot.slane %v1043_v5, 4  ;;  %v847_v35 = vrot.slane %v846_v4, 1 }
 0x23f   : > { %v1045_v7 = vadd.f32 %v1044_v6, %v1043_v5  ;;  %v848_v8 = vadd.f32 %v847_v35, %v846_v4 }
 0x241   : > { %v1046_v9 = vrot.slane %v1045_v7, 2  ;;  %1281 = vpush %v848_v8 }
 0x243   : > { %v1047_v10 = vadd.f32 %v1046_v9, %v1045_v7 }
 0x245   : > { %v1048_v11 = vrot.slane %v1047_v10, 1 }
 0x247   : > { %v1049_v12 = vadd.f32 %v1048_v11, %v1047_v10 }
 0x249   : > { %1283 = vpush %v1049_v12 }
 0x272   : > { %s1282_s14 = spop %1281 }
 0x27a   : > { %s1284_s15 = spop %1283 }
 0x27b   : > { %s1051_s16 = sadd.f32 %s1284_s15, %s1282_s14 }
 0x27d   : > { %v1052_v13 = vstv %s1051_s16 }
 0x27e   : > { %1053 = vst [vmem:[%s326_s7] sm:$0xff] %v1052_v13 }
 0x27f   : > { %1460 = shalt.err (!%p1457_p3)
}
 0x280   : > { %1291 = dma.vmem_to_hbm [thread:$0]  (%p1583_p11), %s1068_s17, 128, %s1070_s13, %s1055_s27  }
 0x281 PF: > { %s1943_s23 = sld [smem:[#allocation15_spill]]  ;;  %s1081_s24 = sand.u32 1, %s1491_s18  }
 0x282   : > { %s1082_s9 = scalar_lea.sflag [#allocation6], %s1081_s24 }
 0x287   : > { %p1944_p4 = scmp.ge.s32.totalorder %s1943_s23, 2 }
 0x289   : > { %p1304_p5 = pnand %p1944_p4, %p1587_p12 }
 0x28b   : > { %p1305_p7 = pneg %p1304_p5 }
 0x28d   : > { %1486 = dma.done.wait (%p1305_p7), %s1082_s9, 128  }
 0x28e   : > { %1488 = vsyncadd (%p1305_p7), %s1082_s9, 4294967168  ;;  %s1945_s21 = sld [smem:[#allocation16_spill]]  ;;  %s1948_s18 = smov %s1495_s19 }
 0x28f   : > { %s1946_s8 = sld [smem:[#allocation14_spill]] }
 0x290   : > { %s1947_s20 = sld [smem:[#allocation17_spill]] }
 0x294   : > { %p21_p8 = scmp.ge.s32.totalorder %s1945_s21, 4  }
 0x295   : > { %s1949_s19 = smov %s1946_s8 }
 0x296   :  { %23 = sbr.rel (!%p21_p8) target bundleno = 9 (0x9), region = 121 }
 0x29b   :  { %1088 = vsyncpa [#allocation5], 1 }
 0x29c   :  { %1090 = vsyncpa [#allocation5 + $0x1], 1 }
 0x29d   :  { %1091 = vsyncpa [#allocation8], 1 }
 0x29e   :  { %1093 = vsyncpa [#allocation8 + $0x1], 1 }
 0x29f   :  { %1094 = vsyncpa [#allocation6], 1 }
 0x2a0   :  { %1096 = vsyncpa [#allocation6 + $0x1], 1 }

</bundles_post_ra>
